<compile_context>
chip_gen: v7x
topology: tpu7x:2x2x1
jax: 0.10.0
libtpu: 0.0.40
codegen_flags: <defaults>
</compile_context>

<pallas_src>
import functools

import jax
import jax.numpy as jnp
from jax.experimental import pallas as pl
from jax.experimental.pallas import tpu as pltpu


def _round_up(v, m):
    return ((v + m - 1) // m) * m


def mlp_kernel(x_ref, w1_ref, b1_ref, w2_ref, b2_ref, w3_ref, b3_ref, o_ref):
    # x_ref: (in=2, TN) with the batch on the lane axis.
    x = x_ref[...]
    # layer_1 + ReLU   -> (10, TN)
    h1 = jnp.dot(w1_ref[...], x, preferred_element_type=jnp.float32)
    h1 = jnp.maximum(h1 + b1_ref[...], 0.0)
    # layer_2 + ReLU   -> (10, TN)
    h2 = jnp.dot(w2_ref[...], h1.astype(w2_ref.dtype),
                 preferred_element_type=jnp.float32)
    h2 = jnp.maximum(h2 + b2_ref[...], 0.0)
    # layer_3 (no activation, matches forward())   -> (1, TN)
    out = jnp.dot(w3_ref[...], h2.astype(w3_ref.dtype),
                  preferred_element_type=jnp.float32)
    o_ref[...] = (out + b3_ref[...]).astype(o_ref.dtype)


@functools.partial(jax.jit, static_argnames=("tile_n", "compute_dtype"))
def circle_model_v2(x, params, *, tile_n=8192, compute_dtype=jnp.float32):
    """x: (N, 2) float32 (PyTorch convention). Returns (N, 1) float32."""
    n = x.shape[0]

    # Re-orient: batch on the lane axis; weights kept as (out, in).
    xt = x.T.astype(compute_dtype)                           # (2, N)
    w1 = params["w1"].astype(compute_dtype)                  # (10, 2)
    w2 = params["w2"].astype(compute_dtype)                  # (10, 10)
    w3 = params["w3"].astype(compute_dtype)                  # (1, 10)
    b1 = params["b1"].reshape(-1, 1).astype(jnp.float32)     # (10, 1)
    b2 = params["b2"].reshape(-1, 1).astype(jnp.float32)     # (10, 1)
    b3 = params["b3"].reshape(-1, 1).astype(jnp.float32)     # (1, 1)

    d_in, h1_dim, h2_dim, d_out = w1.shape[1], w1.shape[0], w2.shape[0], w3.shape[0]

    # Lane tile: multiple of 128; clamp so tiny batches don't over-pad.
    tn = max(128, min(tile_n, _round_up(n, 128)))
    grid = (pl.cdiv(n, tn),)   # Pallas pads the ragged final block; padded
                               # columns are computed but never written back.

    const = lambda i: (0, 0)   # weights/biases: same block every step (VMEM-resident)

    itemsize = jnp.dtype(compute_dtype).itemsize
    cost = pl.CostEstimate(
        flops=2 * n * (d_in * h1_dim + h1_dim * h2_dim + h2_dim * d_out),
        transcendentals=0,
        bytes_accessed=n * (d_in * itemsize + d_out * 4)
        + (d_in * h1_dim + h1_dim * h2_dim + h2_dim * d_out) * itemsize
        + (h1_dim + h2_dim + d_out) * 4,
    )

    out_t = pl.pallas_call(
        mlp_kernel,
        out_shape=jax.ShapeDtypeStruct((d_out, n), jnp.float32),
        grid=grid,
        in_specs=[
            pl.BlockSpec((d_in, tn), lambda i: (0, i)),      # x tile (batch on lanes)
            pl.BlockSpec((h1_dim, d_in), const),             # w1
            pl.BlockSpec((h1_dim, 1), const),                # b1
            pl.BlockSpec((h2_dim, h1_dim), const),           # w2
            pl.BlockSpec((h2_dim, 1), const),                # b2
            pl.BlockSpec((d_out, h2_dim), const),            # w3
            pl.BlockSpec((d_out, 1), const),                 # b3
        ],
        out_specs=pl.BlockSpec((d_out, tn), lambda i: (0, i)),
        compiler_params=pltpu.CompilerParams(
            dimension_semantics=("parallel",),               # megacore-shard batch on v7x
            vmem_limit_bytes=32 * 1024 * 1024,
        ),
        cost_estimate=cost,
    )(xt, w1, b1, w2, b2, w3, b3)

    # (1, N) -> (N, 1): matches PyTorch output shape.
    return out_t.reshape(n, 1)


def init_params(key):
    """Deterministic synthetic params matching CircleModelV2's shapes
    (nn.Linear stores weight as (out_features, in_features))."""
    k1, k2, k3, k4, k5, k6 = jax.random.split(key, 6)
    return {
        "w1": jax.random.normal(k1, (10, 2), jnp.float32) * 0.5,
        "b1": jax.random.normal(k2, (10,), jnp.float32) * 0.1,
        "w2": jax.random.normal(k3, (10, 10), jnp.float32) * 0.5,
        "b2": jax.random.normal(k4, (10,), jnp.float32) * 0.1,
        "w3": jax.random.normal(k5, (1, 10), jnp.float32) * 0.5,
        "b3": jax.random.normal(k6, (1,), jnp.float32) * 0.1,
    }


def reference_forward(x, p):
    h1 = jnp.maximum(x @ p["w1"].T + p["b1"], 0.0)
    h2 = jnp.maximum(h1 @ p["w2"].T + p["b2"], 0.0)
    return h2 @ p["w3"].T + p["b3"]


if __name__ == "__main__":
    key = jax.random.PRNGKey(0)
    pkey, xkey1, xkey2 = jax.random.split(key, 3)
    params = init_params(pkey)

    # Small batch of 2-D "circle" points, matching nn.Linear(in_features=2).
    x_small = jax.random.normal(xkey1, (8, 2), jnp.float32)
    out_small = jax.block_until_ready(circle_model_v2(x_small, params))
    ref_small = reference_forward(x_small, params)
    assert out_small.shape == (8, 1), out_small.shape
    assert jnp.allclose(out_small, ref_small, atol=1e-5, rtol=1e-5), "mismatch (small)"

    # Exercise the tiled path: multiple grid steps + ragged final block.
    x_big = jax.random.normal(xkey2, (300, 2), jnp.float32)
    out_big = jax.block_until_ready(circle_model_v2(x_big, params, tile_n=128))
    ref_big = reference_forward(x_big, params)
    assert out_big.shape == (300, 1), out_big.shape
    assert jnp.allclose(out_big, ref_big, atol=1e-5, rtol=1e-5), "mismatch (tiled)"

    print("KERNEL_OK")
</pallas_src>

<mosaic_0001>
module attributes {stable_mosaic.version = 11 : i64} {
  func.func @mlp_kernel(%arg0: i32, %arg1: memref<2x128xf32, #tpu.memory_space<vmem>>, %arg2: memref<10x2xf32, #tpu.memory_space<vmem>>, %arg3: memref<10x1xf32, #tpu.memory_space<vmem>>, %arg4: memref<10x10xf32, #tpu.memory_space<vmem>>, %arg5: memref<10x1xf32, #tpu.memory_space<vmem>>, %arg6: memref<1x10xf32, #tpu.memory_space<vmem>>, %arg7: memref<1x1xf32, #tpu.memory_space<vmem>>, %arg8: memref<1x128xf32, #tpu.memory_space<vmem>>) attributes {dimension_semantics = [#tpu.dimension_semantics<parallel>], iteration_bounds = array<i64: 1>, scalar_prefetch = 0 : i64, scratch_operands = 0 : i64, tpu.core_type = #tpu.core_type<tc>, window_params = [{transform_indices = @transform_0, window_bounds = array<i64: 2, 128>}, {pipeline_mode = #tpu.pipeline_mode<synchronous>, transform_indices = @transform_1, window_bounds = array<i64: 10, 2>}, {pipeline_mode = #tpu.pipeline_mode<synchronous>, transform_indices = @transform_2, window_bounds = array<i64: 10, 1>}, {pipeline_mode = #tpu.pipeline_mode<synchronous>, transform_indices = @transform_3, window_bounds = array<i64: 10, 10>}, {pipeline_mode = #tpu.pipeline_mode<synchronous>, transform_indices = @transform_4, window_bounds = array<i64: 10, 1>}, {pipeline_mode = #tpu.pipeline_mode<synchronous>, transform_indices = @transform_5, window_bounds = array<i64: 1, 10>}, {pipeline_mode = #tpu.pipeline_mode<synchronous>, transform_indices = @transform_6, window_bounds = array<i64: 1, 1>}, {transform_indices = @transform_7, window_bounds = array<i64: 1, 128>}]} {
    %c0 = arith.constant 0 : index
    %c0_0 = arith.constant 0 : index
    %0 = vector.load %arg1[%c0, %c0_0] : memref<2x128xf32, #tpu.memory_space<vmem>>, vector<2x128xf32>
    %c0_1 = arith.constant 0 : index
    %c0_2 = arith.constant 0 : index
    %1 = vector.load %arg2[%c0_1, %c0_2] : memref<10x2xf32, #tpu.memory_space<vmem>>, vector<10x2xf32>
    %cst = arith.constant dense<0.000000e+00> : vector<10x128xf32>
    %2 = tpu.matmul %1, %0, %cst {dimension_numbers = #tpu.dot_dimension_numbers<[1], [0], [0], [1], [0, 0, 1, 1], [], []>} : vector<10x2xf32>, vector<2x128xf32>, vector<10x128xf32> -> vector<10x128xf32>
    %c0_3 = arith.constant 0 : index
    %c0_4 = arith.constant 0 : index
    %3 = vector.load %arg3[%c0_3, %c0_4] : memref<10x1xf32, #tpu.memory_space<vmem>>, vector<10x1xf32>
    %4 = vector.broadcast %3 : vector<10x1xf32> to vector<10x128xf32>
    %5 = arith.addf %2, %4 : vector<10x128xf32>
    %cst_5 = arith.constant 0.000000e+00 : f32
    %6 = vector.broadcast %cst_5 : f32 to vector<10x128xf32>
    %7 = arith.maximumf %5, %6 : vector<10x128xf32>
    %c0_6 = arith.constant 0 : index
    %c0_7 = arith.constant 0 : index
    %8 = vector.load %arg4[%c0_6, %c0_7] : memref<10x10xf32, #tpu.memory_space<vmem>>, vector<10x10xf32>
    %cst_8 = arith.constant dense<0.000000e+00> : vector<10x128xf32>
    %9 = tpu.matmul %8, %7, %cst_8 {dimension_numbers = #tpu.dot_dimension_numbers<[1], [0], [0], [1], [0, 0, 1, 1], [], []>} : vector<10x10xf32>, vector<10x128xf32>, vector<10x128xf32> -> vector<10x128xf32>
    %c0_9 = arith.constant 0 : index
    %c0_10 = arith.constant 0 : index
    %10 = vector.load %arg5[%c0_9, %c0_10] : memref<10x1xf32, #tpu.memory_space<vmem>>, vector<10x1xf32>
    %11 = vector.broadcast %10 : vector<10x1xf32> to vector<10x128xf32>
    %12 = arith.addf %9, %11 : vector<10x128xf32>
    %cst_11 = arith.constant 0.000000e+00 : f32
    %13 = vector.broadcast %cst_11 : f32 to vector<10x128xf32>
    %14 = arith.maximumf %12, %13 : vector<10x128xf32>
    %c0_12 = arith.constant 0 : index
    %c0_13 = arith.constant 0 : index
    %15 = vector.load %arg6[%c0_12, %c0_13] : memref<1x10xf32, #tpu.memory_space<vmem>>, vector<1x10xf32>
    %cst_14 = arith.constant dense<0.000000e+00> : vector<1x128xf32>
    %16 = tpu.matmul %15, %14, %cst_14 {dimension_numbers = #tpu.dot_dimension_numbers<[1], [0], [0], [1], [0, 0, 1, 1], [], []>} : vector<1x10xf32>, vector<10x128xf32>, vector<1x128xf32> -> vector<1x128xf32>
    %c0_15 = arith.constant 0 : index
    %c0_16 = arith.constant 0 : index
    %17 = vector.load %arg7[%c0_15, %c0_16] : memref<1x1xf32, #tpu.memory_space<vmem>>, vector<1x1xf32>
    %18 = vector.broadcast %17 : vector<1x1xf32> to vector<1x128xf32>
    %19 = arith.addf %16, %18 : vector<1x128xf32>
    %c0_17 = arith.constant 0 : index
    %c0_18 = arith.constant 0 : index
    %20 = vector.load %arg8[%c0_17, %c0_18] : memref<1x128xf32, #tpu.memory_space<vmem>>, vector<1x128xf32>
    tpu.vector_store %arg8[%c0_17, %c0_18], %19 {strides = array<i32>} : memref<1x128xf32, #tpu.memory_space<vmem>>, vector<1x128xf32>,
    return
  }
  func.func @transform_0(%arg0: i32) -> (i32, i32) {
    %c0_i32 = arith.constant 0 : i32
    %c0_i32_0 = arith.constant 0 : i32
    return %c0_i32, %arg0 : i32, i32
  }
  func.func @transform_1(%arg0: i32) -> (i32, i32) {
    %c0_i32 = arith.constant 0 : i32
    %c0_i32_0 = arith.constant 0 : i32
    %c0_i32_1 = arith.constant 0 : i32
    return %c0_i32, %c0_i32_0 : i32, i32
  }
  func.func @transform_2(%arg0: i32) -> (i32, i32) {
    %c0_i32 = arith.constant 0 : i32
    %c0_i32_0 = arith.constant 0 : i32
    %c0_i32_1 = arith.constant 0 : i32
    return %c0_i32, %c0_i32_0 : i32, i32
  }
  func.func @transform_3(%arg0: i32) -> (i32, i32) {
    %c0_i32 = arith.constant 0 : i32
    %c0_i32_0 = arith.constant 0 : i32
    %c0_i32_1 = arith.constant 0 : i32
    return %c0_i32, %c0_i32_0 : i32, i32
  }
  func.func @transform_4(%arg0: i32) -> (i32, i32) {
    %c0_i32 = arith.constant 0 : i32
    %c0_i32_0 = arith.constant 0 : i32
    %c0_i32_1 = arith.constant 0 : i32
    return %c0_i32, %c0_i32_0 : i32, i32
  }
  func.func @transform_5(%arg0: i32) -> (i32, i32) {
    %c0_i32 = arith.constant 0 : i32
    %c0_i32_0 = arith.constant 0 : i32
    %c0_i32_1 = arith.constant 0 : i32
    return %c0_i32, %c0_i32_0 : i32, i32
  }
  func.func @transform_6(%arg0: i32) -> (i32, i32) {
    %c0_i32 = arith.constant 0 : i32
    %c0_i32_0 = arith.constant 0 : i32
    %c0_i32_1 = arith.constant 0 : i32
    return %c0_i32, %c0_i32_0 : i32, i32
  }
  func.func @transform_7(%arg0: i32) -> (i32, i32) {
    %c0_i32 = arith.constant 0 : i32
    %c0_i32_0 = arith.constant 0 : i32
    return %c0_i32, %arg0 : i32, i32
  }
}

</mosaic_0001>

<bundles_post_ra>
// kernel: circle_model_v2.1
= control target key start
LH: loop header
LB: loop body
LE: loop exit
PB: predicated region body
PF: predicated region fallthrough
CT: control target
= control target key end

     0   :  { %s521_s0 = inlined_call_operand.vmem [shape: f32[2,8], index: 0, kind: input, shape index: {}]   ;;  %s522_s1 = inlined_call_operand.vmem [shape: f32[10,2], index: 1, kind: input, shape index: {}]   ;;  %s523_s2 = inlined_call_operand.vmem [shape: f32[10,1], index: 2, kind: input, shape index: {}]   ;;  %s524_s3 = inlined_call_operand.vmem [shape: f32[10,10], index: 3, kind: input, shape index: {}]   ;;  %s525_s4 = inlined_call_operand.vmem [shape: f32[10,1], index: 4, kind: input, shape index: {}]   ;;  %s526_s5 = inlined_call_operand.vmem [shape: f32[1,10], index: 5, kind: input, shape index: {}]   ;;  %s527_s6 = inlined_call_operand.<no memory space> [shape: f32[1,1], index: 6, kind: input, shape index: {}]   ;;  %s528_s7 = inlined_call_operand.hbm [shape: f32[1,8], index: 7, kind: output, shape index: {}]  }
   0x1   :  { %v12_v0 = vstv %s527_s6 }
   0x2   :  { %13 = vst [vmem:[#allocation2] sm:$0x1] %v12_v0 }
   0x3   :  { %v29_v1 = vld [vmem:[%s521_s0] sm:$0x3]  ;;  %vm51_vm0 = vcmask 1041408   ;;  %vm44_vm1 = vcmask 15360   ;;  %v31_v3 = vld [vmem:[%s522_s1 + $0x8] sm:$0x3] }
   0x4   :  { %v30_v2 = vld [vmem:[%s522_s1] sm:$0xff]  ;;  %353 = vmatprep.subr.msk.mxu0 %vm51_vm0, %v29_v1  ;;  %v414_v5 = vmov 0  }
   0x5   :  { %355 = vmatprep.mubr.msk.f32.mxu0 %vm44_vm1, %v30_v2  ;;  %v32_v4 = vld [vmem:[%s523_s2] sm:$0xff]  ;;  %354 = vmatpush3.msk.msra.mxu0 %vm51_vm0, %v29_v1 }
   0x6   :  { %388 = vset.pattern.permute.xlu0 %v414_v5 }
   0x7   :  { %14 = vsyncpa [#allocation4], 0  ;;  %356 = vmatmul.mubr.msk.f32.vlgmr.msra.gmra.mrb[0].mxu0 %vm44_vm1, %v31_v3  ;;  %36 = vperm.xlu0 %388, %v32_v4   ;;  %v33_v6 = vld [vmem:[%s523_s2 + $0x8] sm:$0x3]  ;;  %v132_v8 = vld [vmem:[%s524_s3] sm:$0xff]  ;;  %vm146_vm2 = vcmask 80896   ;;  %v240_v34 = vlaneseq }
   0x8   :  { %389 = vset.pattern.permute.xlu1 %v414_v5  ;;  %362 = vmatprep.mubr.msk.f32.mxu1 %vm146_vm2, %v132_v8  ;;  %v134_v9 = vld [vmem:[%s525_s4] sm:$0xff]  ;;  %v135_v10 = vld [vmem:[%s525_s4 + $0x8] sm:$0x3]  ;;  %vm415_vm3 = vmmov 1   ;;  %v416_v22 = vmov 0.0|0.0   ;;  %vm417_vm5 = vmmov 0  }
   0x9   :  { %v234_v7 = vld [vmem:[#allocation2] sm:$0x1]  ;;  %138 = vperm.xlu1 %389, %v134_v9   ;;  %vm491_vm4 = vmpackc.low %vm51_vm0, %vm415_vm3  ;;  %v133_v21 = vld [vmem:[%s524_s3 + $0x8] sm:$0x3]  ;;  %378 = vmatprep.subr.bf16.mxu0 %v416_v22  ;;  %v418_v23 = vmov 0.0   ;;  %v241_v35 = vshrl.u32 %v240_v34, 7 }
   0xa   :  { %369 = vmatprep.mubr.msk.f32.mxu0 %vm417_vm5, %v418_v23  ;;  %v233_v33 = vld [vmem:[%s526_s5] sm:$0x1]  ;;  %s419_s17 = smov [#allocation3]  }
   0xb   :  { %41 = vperm.xlu0 %388, %v33_v6   ;;  %v242_v36 = vsub.s32 0, %v241_v35  ;;  %s327_s18 = sshll.u32 %s419_s17, 4  ;;  %s328_s18 = int_to_ptr.vmem [resolvable:$true] %s327_s18 }
   0xc   :  { %s390_s19 = scalar_lea.vmem %s328_s18, 16  ;;  %s394_s20 = scalar_lea.vmem %s328_s18, 32 }
   0xd   :  { %143 = vperm.xlu1 %389, %v135_v10   ;;  %p391_p0 = scmp.ne.s32.totalorder %s328_s18, %s390_s19  ;;  %p395_p1 = scmp.lt.s32.totalorder %s328_s18, %s328_s18 }
   0xe   :  { %p396_p2 = scmp.lt.s32.totalorder %s394_s20, %s390_s19 }
   0xf   :  { %237 = vperm.xlu0 %388, %v234_v7  }
  0x10   :  { %p397_p3 = por %p396_p2, %p395_p1 }
  0x12   :  { %p398_p4 = pnand %p397_p3, %p391_p0 }
  0x86   :  { %v37_v11 = vpop.permute.xlu0 %36 }
  0x88   :  { %v139_v24 = vpop.permute.xlu1 %138 }
  0x8a   :  { %v42_v12 = vpop.permute.xlu0 %41 }
  0x8c   :  { %v144_v25 = vpop.permute.xlu1 %143 }
  0x8e   :  { %v238_v37 = vpop.permute.xlu0 %237 }
  0x8f   :  { %v243_v38 = vrot.slane %v238_v37, %v242_v36 }
  0xda   :  { %v357_v13 = vpop.f32.mrb[0].mxu0 }
  0xdb   :  { %v127_v14 = vadd.f32 %v357_v13, %v42_v12  ;;  %v121_v15 = vpop.f32.mrb[1].mxu0 }
  0xdc   :  { %v122_v16 = vadd.f32 %v121_v15, %v37_v11 }
  0xdd   :  { %v131_v17 = vmax.f32 %v127_v14, 0.0 }
  0xde   :  { %v130_v18 = vmax.f32 %v122_v16, 0.0 }
  0xe0   :  { %v372_v20 = vpack.c.bf16 %v131_v17, %v130_v18 }
  0xe2   :  { %374 = vmatprep.subr.msk.bf16.mxu1 %vm491_vm4, %v372_v20 }
  0xe3   :  { %377 = vmatpush3.bf16.msk.msra.mxu1 %vm491_vm4, %v372_v20 }
  0xe6   :  { %363 = vmatmul.mubr.msk.f32.vlgmr.msra.gmra.mrb[0].mxu1 %vm146_vm2, %v133_v21 }
 0x1b9   :  { %v364_v26 = vpop.f32.mrb[0].mxu1 }
 0x1ba   :  { %v228_v27 = vadd.f32 %v364_v26, %v144_v25  ;;  %v222_v28 = vpop.f32.mrb[1].mxu1 }
 0x1bb   :  { %v223_v29 = vadd.f32 %v222_v28, %v139_v24 }
 0x1bc   :  { %v232_v30 = vmax.f32 %v228_v27, 0.0 }
 0x1bd   :  { %v231_v31 = vmax.f32 %v223_v29, 0.0 }
 0x1bf   :  { %v379_v32 = vpack.c.bf16 %v232_v30, %v231_v31 }
 0x1c1   :  { %381 = vmatpush3.bf16.msk.msra.mxu0 %vm491_vm4, %v379_v32 }
 0x1c4   :  { %370 = vmatmul.mubr.msk.f32.vlgmr.msra.gmra.mrb[2].mxu0 %vm146_vm2, %v233_v33 }
 0x297   :  { %v316_v39 = vpop.f32.mrb[2].mxu0 }
 0x298   :  { %v317_v40 = vadd.f32 %v316_v39, %v243_v38  ;;  %v371_v41 = vpop.f32.mrb[3].mxu0 }
 0x29a   :  { %320 = vst [vmem:[#allocation3] sm:$0x1] %v317_v40 }
 0x29b   :  { %401 = shalt.err (!%p398_p4)
}
 0x29c   :  { %s402_s22 = scalar_lea.hbm %s528_s7, 16 }
 0x29d   :  { %p403_p5 = scmp.ne.s32.totalorder %s528_s7, %s402_s22  ;;  %p406_p6 = scmp.lt.u32.totalorder %s402_s22, %s528_s7 }
 0x29f   :  { %p408_p7 = pnand %p406_p6, %p403_p5 }
 0x2a1   :  { %411 = shalt.err (!%p408_p7)
}
 0x2a2   :  { %330 = dma.vmem_to_hbm [thread:$0]  %s328_s18, 16, %s528_s7, [#allocation4]  }
 0x2a3   :  { %412 = dma.done.wait [#allocation4], 16  }
 0x2a4   :  { %413 = vsyncadd [#allocation4], 4294967280 }
 0x2a5   :  { %334 = vsyncpa [#allocation4], 1 }

</bundles_post_ra>
